<compile_context>
chip_gen: v5e
topology: v5e:2x2
jax: 0.10.0
libtpu: 0.0.40
codegen_flags: <defaults>
</compile_context>

<pallas_src>
import functools

import jax
import jax.numpy as jnp
from jax.experimental import pallas as pl
from jax.experimental.pallas import tpu as pltpu


def _round_up(x, m):
    return (x + m - 1) // m * m


def _ppo_fused_kernel(x_ref, w1_ref, b1_ref, w2_ref, b2_ref, wh_ref, bh_ref,
                      out_ref, *, actionsize):
    # x tile: (TB, inputsize).  Weights are VMEM-resident across grid steps.
    x = x_ref[...].astype(w1_ref.dtype)

    # Fused actor|critic trunk: two lane-dense matmuls with fp32 accumulation.
    h = jnp.dot(x, w1_ref[...], preferred_element_type=jnp.float32) + b1_ref[...]
    h = jnp.maximum(h, 0.0)
    h = jnp.dot(h.astype(w2_ref.dtype), w2_ref[...],
                preferred_element_type=jnp.float32) + b2_ref[...]
    h = jnp.maximum(h, 0.0)

    # Fused heads: cols [0, A) = actor @ Wm + bm, col A = critic @ Wv + bv, rest 0.
    y = jnp.dot(h.astype(wh_ref.dtype), wh_ref[...],
                preferred_element_type=jnp.float32) + bh_ref[...]

    # tanh only applies to the mean columns; the value column passes through.
    col = jax.lax.broadcasted_iota(jnp.int32, y.shape, 1)
    out_ref[...] = jnp.where(col < actionsize, jnp.tanh(y), y)


def pack_params(params, matmul_dtype=jnp.float32):
    """Pack per-layer weights into fused lane-dense matrices (done once)."""
    H = params["actor_w2"].shape[0]
    A = params["mean_w"].shape[1]
    F2 = 2 * H
    head_n = max(128, _round_up(A + 1, 128))  # lane-dense head width

    w1 = jnp.concatenate([params["actor_w1"], params["critic_w1"]], axis=1)
    b1 = jnp.concatenate([params["actor_b1"], params["critic_b1"]], axis=1)

    w2 = jnp.zeros((F2, F2), jnp.float32)
    w2 = w2.at[:H, :H].set(params["actor_w2"]).at[H:, H:].set(params["critic_w2"])
    b2 = jnp.concatenate([params["actor_b2"], params["critic_b2"]], axis=1)

    wh = jnp.zeros((F2, head_n), jnp.float32)
    wh = wh.at[:H, :A].set(params["mean_w"]).at[H:, A].set(params["v_w"][:, 0])
    bh = jnp.zeros((1, head_n), jnp.float32)
    bh = bh.at[0, :A].set(params["mean_b"][0]).at[0, A].set(params["v_b"][0, 0])

    return {
        "w1": w1.astype(matmul_dtype), "b1": b1,
        "w2": w2.astype(matmul_dtype), "b2": b2,
        "wh": wh.astype(matmul_dtype), "bh": bh,
        "actionsize": A, "hidden": H, "head_n": head_n,
    }


def ppo_forward(x, params, *, block_b=256, matmul_dtype=jnp.float32):
    B, F_in = x.shape
    packed = pack_params(params, matmul_dtype)
    A = packed["actionsize"]
    F2 = 2 * packed["hidden"]
    HEAD_N = packed["head_n"]

    # Batch tile: whole batch if small, else 256-row tiles (well under VMEM limits
    # on v5e/v6e/v7x even with double-buffering).
    TB = block_b if B > block_b else B
    grid = (pl.cdiv(B, TB),)

    # Advisory cost hint for XLA scheduling around the custom call.
    flops = 2 * B * (F_in * F2 + F2 * F2 + F2 * HEAD_N)
    bytes_accessed = 4 * (B * F_in + F_in * F2 + F2 * F2 + F2 * HEAD_N
                          + 3 * F2 + B * HEAD_N)
    cost = pl.CostEstimate(flops=flops, transcendentals=B * HEAD_N,
                           bytes_accessed=bytes_accessed)

    kernel = functools.partial(_ppo_fused_kernel, actionsize=A)

    slab = pl.pallas_call(
        kernel,
        out_shape=jax.ShapeDtypeStruct((B, HEAD_N), jnp.float32),
        grid=grid,
        in_specs=[
            pl.BlockSpec((TB, F_in), lambda i: (i, 0)),       # x tile
            pl.BlockSpec((F_in, F2), lambda i: (0, 0)),       # fused W1 (resident)
            pl.BlockSpec((1, F2), lambda i: (0, 0)),          # fused b1
            pl.BlockSpec((F2, F2), lambda i: (0, 0)),         # block-diag W2
            pl.BlockSpec((1, F2), lambda i: (0, 0)),          # fused b2
            pl.BlockSpec((F2, HEAD_N), lambda i: (0, 0)),     # fused head W
            pl.BlockSpec((1, HEAD_N), lambda i: (0, 0)),      # fused head b
        ],
        out_specs=pl.BlockSpec((TB, HEAD_N), lambda i: (i, 0)),
        compiler_params=pltpu.CompilerParams(
            dimension_semantics=("parallel",)),
        cost_estimate=cost,
    )(x, packed["w1"], packed["b1"], packed["w2"], packed["b2"],
      packed["wh"], packed["bh"])

    mean = slab[:, :A]
    v = slab[:, A:A + 1]
    # std is input-independent: compute in plain JAX (free for XLA).
    std = jnp.broadcast_to(jnp.exp(params["logstd_b"]), mean.shape)
    return (mean, std), v


def init_params(key, inputsize, actionsize, hidden_size=64):
    """Deterministic synthetic parameter init (PyTorch-default-like scaling)."""
    ks = jax.random.split(key, 12)

    def linear(kw, kb, fan_in, fan_out):
        bound = 1.0 / jnp.sqrt(fan_in)
        w = jax.random.uniform(kw, (fan_in, fan_out), jnp.float32, -bound, bound)
        b = jax.random.uniform(kb, (1, fan_out), jnp.float32, -bound, bound)
        return w, b

    p = {}
    p["actor_w1"], p["actor_b1"] = linear(ks[0], ks[1], inputsize, hidden_size)
    p["actor_w2"], p["actor_b2"] = linear(ks[2], ks[3], hidden_size, hidden_size)
    p["critic_w1"], p["critic_b1"] = linear(ks[4], ks[5], inputsize, hidden_size)
    p["critic_w2"], p["critic_b2"] = linear(ks[6], ks[7], hidden_size, hidden_size)
    p["mean_w"], p["mean_b"] = linear(ks[8], ks[9], hidden_size, actionsize)
    p["v_w"], p["v_b"] = linear(ks[10], ks[11], hidden_size, 1)
    # AddBias parameter: torch.zeros(actionsize)
    p["logstd_b"] = jnp.zeros((1, actionsize), jnp.float32)
    return p


def ppo_reference(x, params):
    """Pure-JAX reference for correctness checking."""
    relu = lambda t: jnp.maximum(t, 0.0)
    a = relu(x @ params["actor_w1"] + params["actor_b1"])
    a = relu(a @ params["actor_w2"] + params["actor_b2"])
    c = relu(x @ params["critic_w1"] + params["critic_b1"])
    c = relu(c @ params["critic_w2"] + params["critic_b2"])
    mean = jnp.tanh(a @ params["mean_w"] + params["mean_b"])
    v = c @ params["v_w"] + params["v_b"]
    std = jnp.broadcast_to(jnp.exp(params["logstd_b"]), mean.shape)
    return (mean, std), v


if __name__ == "__main__":
    B, INPUTSIZE, ACTIONSIZE, HIDDEN = 8, 32, 4, 64

    key = jax.random.PRNGKey(0)
    k_x, k_p = jax.random.split(key)
    x = jax.random.normal(k_x, (B, INPUTSIZE), jnp.float32)
    params = init_params(k_p, INPUTSIZE, ACTIONSIZE, HIDDEN)

    (mean, std), v = ppo_forward(x, params)
    jax.block_until_ready((mean, std, v))

    (mean_ref, std_ref), v_ref = ppo_reference(x, params)
    assert mean.shape == (B, ACTIONSIZE) and std.shape == (B, ACTIONSIZE)
    assert v.shape == (B, 1)
    assert jnp.allclose(mean, mean_ref, atol=1e-5)
    assert jnp.allclose(std, std_ref, atol=1e-5)
    assert jnp.allclose(v, v_ref, atol=1e-5)

    print("KERNEL_OK")
</pallas_src>

<mosaic_0001>
module attributes {stable_mosaic.version = 11 : i64} {
  func.func @_ppo_fused_kernel(%arg0: i32, %arg1: memref<8x32xf32, #tpu.memory_space<vmem>>, %arg2: memref<32x128xf32, #tpu.memory_space<vmem>>, %arg3: memref<1x128xf32, #tpu.memory_space<vmem>>, %arg4: memref<128x128xf32, #tpu.memory_space<vmem>>, %arg5: memref<1x128xf32, #tpu.memory_space<vmem>>, %arg6: memref<128x128xf32, #tpu.memory_space<vmem>>, %arg7: memref<1x128xf32, #tpu.memory_space<vmem>>, %arg8: memref<8x128xf32, #tpu.memory_space<vmem>>) attributes {dimension_semantics = [#tpu.dimension_semantics<parallel>], iteration_bounds = array<i64: 1>, scalar_prefetch = 0 : i64, scratch_operands = 0 : i64, tpu.core_type = #tpu.core_type<tc>, window_params = [{transform_indices = @transform_0, window_bounds = array<i64: 8, 32>}, {pipeline_mode = #tpu.pipeline_mode<synchronous>, transform_indices = @transform_1, window_bounds = array<i64: 32, 128>}, {pipeline_mode = #tpu.pipeline_mode<synchronous>, transform_indices = @transform_2, window_bounds = array<i64: 1, 128>}, {pipeline_mode = #tpu.pipeline_mode<synchronous>, transform_indices = @transform_3, window_bounds = array<i64: 128, 128>}, {pipeline_mode = #tpu.pipeline_mode<synchronous>, transform_indices = @transform_4, window_bounds = array<i64: 1, 128>}, {pipeline_mode = #tpu.pipeline_mode<synchronous>, transform_indices = @transform_5, window_bounds = array<i64: 128, 128>}, {pipeline_mode = #tpu.pipeline_mode<synchronous>, transform_indices = @transform_6, window_bounds = array<i64: 1, 128>}, {transform_indices = @transform_7, window_bounds = array<i64: 8, 128>}]} {
    %c0 = arith.constant 0 : index
    %c0_0 = arith.constant 0 : index
    %0 = vector.load %arg1[%c0, %c0_0] : memref<8x32xf32, #tpu.memory_space<vmem>>, vector<8x32xf32>
    %c0_1 = arith.constant 0 : index
    %c0_2 = arith.constant 0 : index
    %1 = vector.load %arg2[%c0_1, %c0_2] : memref<32x128xf32, #tpu.memory_space<vmem>>, vector<32x128xf32>
    %cst = arith.constant dense<0.000000e+00> : vector<8x128xf32>
    %2 = tpu.matmul %0, %1, %cst {dimension_numbers = #tpu.dot_dimension_numbers<[1], [0], [0], [1], [0, 0, 1, 1], [], []>} : vector<8x32xf32>, vector<32x128xf32>, vector<8x128xf32> -> vector<8x128xf32>
    %c0_3 = arith.constant 0 : index
    %c0_4 = arith.constant 0 : index
    %3 = vector.load %arg3[%c0_3, %c0_4] : memref<1x128xf32, #tpu.memory_space<vmem>>, vector<1x128xf32>
    %4 = vector.broadcast %3 : vector<1x128xf32> to vector<8x128xf32>
    %5 = arith.addf %2, %4 : vector<8x128xf32>
    %cst_5 = arith.constant 0.000000e+00 : f32
    %6 = vector.broadcast %cst_5 : f32 to vector<8x128xf32>
    %7 = arith.maximumf %5, %6 : vector<8x128xf32>
    %c0_6 = arith.constant 0 : index
    %c0_7 = arith.constant 0 : index
    %8 = vector.load %arg4[%c0_6, %c0_7] : memref<128x128xf32, #tpu.memory_space<vmem>>, vector<128x128xf32>
    %cst_8 = arith.constant dense<0.000000e+00> : vector<8x128xf32>
    %9 = tpu.matmul %7, %8, %cst_8 {dimension_numbers = #tpu.dot_dimension_numbers<[1], [0], [0], [1], [0, 0, 1, 1], [], []>} : vector<8x128xf32>, vector<128x128xf32>, vector<8x128xf32> -> vector<8x128xf32>
    %c0_9 = arith.constant 0 : index
    %c0_10 = arith.constant 0 : index
    %10 = vector.load %arg5[%c0_9, %c0_10] : memref<1x128xf32, #tpu.memory_space<vmem>>, vector<1x128xf32>
    %11 = vector.broadcast %10 : vector<1x128xf32> to vector<8x128xf32>
    %12 = arith.addf %9, %11 : vector<8x128xf32>
    %cst_11 = arith.constant 0.000000e+00 : f32
    %13 = vector.broadcast %cst_11 : f32 to vector<8x128xf32>
    %14 = arith.maximumf %12, %13 : vector<8x128xf32>
    %c0_12 = arith.constant 0 : index
    %c0_13 = arith.constant 0 : index
    %15 = vector.load %arg6[%c0_12, %c0_13] : memref<128x128xf32, #tpu.memory_space<vmem>>, vector<128x128xf32>
    %cst_14 = arith.constant dense<0.000000e+00> : vector<8x128xf32>
    %16 = tpu.matmul %14, %15, %cst_14 {dimension_numbers = #tpu.dot_dimension_numbers<[1], [0], [0], [1], [0, 0, 1, 1], [], []>} : vector<8x128xf32>, vector<128x128xf32>, vector<8x128xf32> -> vector<8x128xf32>
    %c0_15 = arith.constant 0 : index
    %c0_16 = arith.constant 0 : index
    %17 = vector.load %arg7[%c0_15, %c0_16] : memref<1x128xf32, #tpu.memory_space<vmem>>, vector<1x128xf32>
    %18 = vector.broadcast %17 : vector<1x128xf32> to vector<8x128xf32>
    %19 = arith.addf %16, %18 : vector<8x128xf32>
    %20 = tpu.iota {dimensions = array<i32: 1>} : vector<8x128xi32>
    %c4_i32 = arith.constant 4 : i32
    %21 = vector.broadcast %c4_i32 : i32 to vector<8x128xi32>
    %22 = arith.cmpi slt, %20, %21 : vector<8x128xi32>
    %23 = math.tanh %19 : vector<8x128xf32>
    %24 = arith.select %22, %23, %19 : vector<8x128xi1>, vector<8x128xf32>
    %c0_17 = arith.constant 0 : index
    %c0_18 = arith.constant 0 : index
    %25 = vector.load %arg8[%c0_17, %c0_18] : memref<8x128xf32, #tpu.memory_space<vmem>>, vector<8x128xf32>
    tpu.vector_store %arg8[%c0_17, %c0_18], %24 {strides = array<i32>} : memref<8x128xf32, #tpu.memory_space<vmem>>, vector<8x128xf32>,
    return
  }
  func.func @transform_0(%arg0: i32) -> (i32, i32) {
    %c0_i32 = arith.constant 0 : i32
    %c0_i32_0 = arith.constant 0 : i32
    return %arg0, %c0_i32 : i32, i32
  }
  func.func @transform_1(%arg0: i32) -> (i32, i32) {
    %c0_i32 = arith.constant 0 : i32
    %c0_i32_0 = arith.constant 0 : i32
    %c0_i32_1 = arith.constant 0 : i32
    return %c0_i32, %c0_i32_0 : i32, i32
  }
  func.func @transform_2(%arg0: i32) -> (i32, i32) {
    %c0_i32 = arith.constant 0 : i32
    %c0_i32_0 = arith.constant 0 : i32
    %c0_i32_1 = arith.constant 0 : i32
    return %c0_i32, %c0_i32_0 : i32, i32
  }
  func.func @transform_3(%arg0: i32) -> (i32, i32) {
    %c0_i32 = arith.constant 0 : i32
    %c0_i32_0 = arith.constant 0 : i32
    %c0_i32_1 = arith.constant 0 : i32
    return %c0_i32, %c0_i32_0 : i32, i32
  }
  func.func @transform_4(%arg0: i32) -> (i32, i32) {
    %c0_i32 = arith.constant 0 : i32
    %c0_i32_0 = arith.constant 0 : i32
    %c0_i32_1 = arith.constant 0 : i32
    return %c0_i32, %c0_i32_0 : i32, i32
  }
  func.func @transform_5(%arg0: i32) -> (i32, i32) {
    %c0_i32 = arith.constant 0 : i32
    %c0_i32_0 = arith.constant 0 : i32
    %c0_i32_1 = arith.constant 0 : i32
    return %c0_i32, %c0_i32_0 : i32, i32
  }
  func.func @transform_6(%arg0: i32) -> (i32, i32) {
    %c0_i32 = arith.constant 0 : i32
    %c0_i32_0 = arith.constant 0 : i32
    %c0_i32_1 = arith.constant 0 : i32
    return %c0_i32, %c0_i32_0 : i32, i32
  }
  func.func @transform_7(%arg0: i32) -> (i32, i32) {
    %c0_i32 = arith.constant 0 : i32
    %c0_i32_0 = arith.constant 0 : i32
    return %arg0, %c0_i32 : i32, i32
  }
}

</mosaic_0001>

<bundles_post_ra>
// kernel: tpu_custom_call.1
= control target key start
LH: loop header
LB: loop body
LE: loop exit
PB: predicated region body
PF: predicated region fallthrough
CT: control target
= control target key end

     0   :  { %12 = vsyncpa [#allocation3], 0  ;;  %s440_s0 = inlined_call_operand.hbm [shape: f32[8,32], index: 0, kind: input, shape index: {}]   ;;  %s441_s1 = inlined_call_operand.hbm [shape: f32[32,128], index: 1, kind: input, shape index: {}]   ;;  %s442_s2 = inlined_call_operand.vmem [shape: f32[1,128], index: 2, kind: input, shape index: {}]   ;;  %s443_s3 = inlined_call_operand.hbm [shape: f32[128,128], index: 3, kind: input, shape index: {}]   ;;  %s444_s4 = inlined_call_operand.vmem [shape: f32[1,128], index: 4, kind: input, shape index: {}]   ;;  %s445_s5 = inlined_call_operand.hbm [shape: f32[128,128], index: 5, kind: input, shape index: {}]   ;;  %s446_s6 = inlined_call_operand.vmem [shape: f32[1,128], index: 6, kind: input, shape index: {}]   ;;  %s447_s7 = inlined_call_operand.hbm [shape: f32[8,128], index: 7, kind: output, shape index: {}]  }
   0x1   :  { %13 = vsyncpa [#allocation6], 0 }
   0x2   :  { %14 = vsyncpa [#allocation9], 0  ;;  %s31_s26 = sshll.u32 %s441_s1, 4  ;;  %s32_s26 = int_to_ptr.hbm [resolvable:$true] %s31_s26 }
   0x3   :  { %15 = vsyncpa [#allocation4], 0  ;;  %s369_s27 = smov [#allocation5]   ;;  %s21_s8 = sshll.u32 %s440_s0, 4  ;;  %s22_s8 = int_to_ptr.hbm [resolvable:$true] %s21_s8 }
   0x4   :  { %s33_s28 = sshll.u32 %s369_s27, 4  ;;  %s370_s9 = smov 128   ;;  %s34_s28 = int_to_ptr.vmem [resolvable:$true] %s33_s28 }
   0x5   :  { %s371_s10 = smov 8   ;;  %s372_s11 = smov [#allocation2]  }
   0x6   :  { %39 = dma.hbm_to_vmem [thread:$0]  %s32_s26, 512, %s34_s28, [#allocation6], %s370_s9, %s370_s9, %s371_s10  }
   0x7   :  { %s23_s12 = sshll.u32 %s372_s11, 4  ;;  %s46_s15 = sshll.u32 %s443_s3, 4  ;;  %s24_s12 = int_to_ptr.vmem [resolvable:$true] %s23_s12  ;;  %s47_s15 = int_to_ptr.hbm [resolvable:$true] %s46_s15 }
   0x8   :  { %26 = dma.hbm_to_vmem [thread:$0]  %s22_s8, 128, %s24_s12, [#allocation3]  }
   0x9   :  { %s61_s17 = sshll.u32 %s445_s5, 4  ;;  %s373_s18 = smov [#allocation7]   ;;  %s62_s17 = int_to_ptr.hbm [resolvable:$true] %s61_s17 }
   0xa   :  { %s48_s19 = sshll.u32 %s373_s18, 4  ;;  %s374_s0 = smov [#allocation8]   ;;  %s49_s19 = int_to_ptr.vmem [resolvable:$true] %s48_s19 }
   0xb   :  { %54 = dma.hbm_to_vmem [thread:$0]  %s47_s15, 2048, %s49_s19, [#allocation6], %s370_s9, %s370_s9, %s371_s10  }
   0xc   :  { %s63_s20 = sshll.u32 %s374_s0, 4  ;;  %s64_s20 = int_to_ptr.vmem [resolvable:$true] %s63_s20 }
   0xd   :  { %69 = dma.hbm_to_vmem [thread:$0]  %s62_s17, 2048, %s64_s20, [#allocation9], %s370_s9, %s370_s9, %s371_s10  }
   0xe   :  { %361 = dma.done.wait [#allocation3], 128  }
   0xf   :  { %362 = vsyncadd [#allocation3], 4294967168 }
  0x10   :  { %363 = dma.done.wait [#allocation6], 2560  }
  0x11   :  { %364 = vsyncadd [#allocation6], 4294964736 }
  0x12   :  { %365 = dma.done.wait [#allocation9], 2048  }
  0x13   :  { %366 = vsyncadd [#allocation9], 4294965248  ;;  %v92_v0 = vld [vmem:[#allocation5 + $0x18] sm:$0xff]  ;;  %v91_v1 = vld [vmem:[#allocation5 + $0x10] sm:$0xff]  ;;  %vm97_vm0 = vcmask 261120   ;;  %v203_v46 = vlaneseq  ;;  %s375_s24 = smov [#allocation10]  }
  0x14   :  { %113 = vmatpush.msra.mxu0 %v92_v0  ;;  %v137_v2 = vld [vmem:[#allocation7 + $0x78] sm:$0xff]  ;;  %v90_v3 = vld [vmem:[#allocation5 + $0x8] sm:$0xff]  ;;  %v136_v4 = vld [vmem:[#allocation7 + $0x70] sm:$0xff]  ;;  %s214_s25 = sshll.u32 %s375_s24, 4  ;;  %s216_s28 = sshll.u32 %s447_s7, 4  ;;  %s215_s25 = int_to_ptr.vmem [resolvable:$true] %s214_s25  ;;  %s217_s28 = int_to_ptr.hbm [resolvable:$true] %s216_s28 }
  0x15   :  { %142 = vmatpush.msra.mxu1 %v137_v2  ;;  %v135_v5 = vld [vmem:[#allocation7 + $0x68] sm:$0xff]  ;;  %v89_v6 = vld [vmem:[#allocation5] sm:$0xff]  ;;  %v88_v7 = vld [vmem:[#allocation2] sm:$0xff]  ;;  %v204_v49 = vand.u32 127, %v203_v46 }
  0x16   :  { %114 = vmatpush.msra.mxu0 %v91_v1  ;;  %v134_v8 = vld [vmem:[#allocation7 + $0x60] sm:$0xff]  ;;  %v133_v9 = vld [vmem:[#allocation7 + $0x58] sm:$0xff]  ;;  %v132_v10 = vld [vmem:[#allocation7 + $0x50] sm:$0xff] }
  0x17   :  { %143 = vmatpush.msra.mxu1 %v136_v4  ;;  %v131_v11 = vld [vmem:[#allocation7 + $0x48] sm:$0xff]  ;;  %v130_v12 = vld [vmem:[#allocation7 + $0x40] sm:$0xff]  ;;  %v129_v13 = vld [vmem:[#allocation7 + $0x38] sm:$0xff]  ;;  %vm205_vm1 = vcmp.lt.s32.totalorder %v204_v49, 4 }
  0x18   :  { %115 = vmatpush.msra.mxu0 %v90_v3  ;;  %v128_v14 = vld [vmem:[#allocation7 + $0x30] sm:$0xff]  ;;  %v127_v15 = vld [vmem:[#allocation7 + $0x28] sm:$0xff]  ;;  %v126_v16 = vld [vmem:[#allocation7 + $0x20] sm:$0xff] }
  0x19   :  { %144 = vmatpush.msra.mxu1 %v135_v5  ;;  %v125_v17 = vld [vmem:[#allocation7 + $0x18] sm:$0xff]  ;;  %v124_v18 = vld [vmem:[#allocation7 + $0x10] sm:$0xff]  ;;  %v123_v19 = vld [vmem:[#allocation7 + $0x8] sm:$0xff] }
  0x1a   :  { %116 = vmatpush.msra.mxu0 %v89_v6  ;;  %v122_v20 = vld [vmem:[#allocation7] sm:$0xff]  ;;  %v178_v21 = vld [vmem:[#allocation8 + $0x78] sm:$0xff]  ;;  %v177_v22 = vld [vmem:[#allocation8 + $0x70] sm:$0xff] }
  0x1b   :  { %228 = vmatmul.msk.f32.vlgmr.msra.gmra.mxu0 %vm97_vm0, %v88_v7  ;;  %145 = vmatpush.msra.mxu1 %v134_v8  ;;  %v176_v23 = vld [vmem:[#allocation8 + $0x68] sm:$0xff]  ;;  %v175_v24 = vld [vmem:[#allocation8 + $0x60] sm:$0xff]  ;;  %v174_v25 = vld [vmem:[#allocation8 + $0x58] sm:$0xff] }
  0x1c   :  { %183 = vmatpush.msra.mxu2 %v178_v21  ;;  %v173_v26 = vld [vmem:[#allocation8 + $0x50] sm:$0xff]  ;;  %v172_v27 = vld [vmem:[#allocation8 + $0x48] sm:$0xff]  ;;  %v171_v28 = vld [vmem:[#allocation8 + $0x40] sm:$0xff] }
  0x1d   :  { %146 = vmatpush.msra.mxu1 %v133_v9  ;;  %v170_v29 = vld [vmem:[#allocation8 + $0x38] sm:$0xff]  ;;  %v169_v30 = vld [vmem:[#allocation8 + $0x30] sm:$0xff]  ;;  %v168_v31 = vld [vmem:[#allocation8 + $0x28] sm:$0xff] }
  0x1e   :  { %184 = vmatpush.msra.mxu2 %v177_v22  ;;  %v167_v32 = vld [vmem:[#allocation8 + $0x20] sm:$0xff]  ;;  %v166_v33 = vld [vmem:[#allocation8 + $0x18] sm:$0xff]  ;;  %v165_v38 = vld [vmem:[#allocation8 + $0x10] sm:$0xff] }
  0x1f   :  { %147 = vmatpush.msra.mxu1 %v132_v10  ;;  %v236_v34 = vld [vmem:[%s442_s2] ss:$0 sm:$0xff]  ;;  %v164_v39 = vld [vmem:[#allocation8 + $0x8] sm:$0xff]  ;;  %v163_v40 = vld [vmem:[#allocation8] sm:$0xff] }
  0x20   :  { %185 = vmatpush.msra.mxu2 %v176_v23  ;;  %v237_v41 = vld [vmem:[%s444_s4] ss:$0 sm:$0xff] }
  0x21   :  { %148 = vmatpush.msra.mxu1 %v131_v11  ;;  %v238_v45 = vld [vmem:[%s446_s6] ss:$0 sm:$0xff] }
  0x22   :  { %186 = vmatpush.msra.mxu2 %v175_v24 }
  0x23   :  { %149 = vmatpush.msra.mxu1 %v130_v12 }
  0x24   :  { %187 = vmatpush.msra.mxu2 %v174_v25 }
  0x25   :  { %150 = vmatpush.msra.mxu1 %v129_v13 }
  0x26   :  { %188 = vmatpush.msra.mxu2 %v173_v26 }
  0x27   :  { %151 = vmatpush.msra.mxu1 %v128_v14 }
  0x28   :  { %189 = vmatpush.msra.mxu2 %v172_v27 }
  0x29   :  { %152 = vmatpush.msra.mxu1 %v127_v15 }
  0x2a   :  { %190 = vmatpush.msra.mxu2 %v171_v28 }
  0x2b   :  { %153 = vmatpush.msra.mxu1 %v126_v16 }
  0x2c   :  { %191 = vmatpush.msra.mxu2 %v170_v29 }
  0x2d   :  { %154 = vmatpush.msra.mxu1 %v125_v17 }
  0x2e   :  { %192 = vmatpush.msra.mxu2 %v169_v30 }
  0x2f   :  { %155 = vmatpush.msra.mxu1 %v124_v18 }
  0x30   :  { %193 = vmatpush.msra.mxu2 %v168_v31 }
  0x31   :  { %156 = vmatpush.msra.mxu1 %v123_v19 }
  0x32   :  { %194 = vmatpush.msra.mxu2 %v167_v32 }
  0x33   :  { %157 = vmatpush.msra.mxu1 %v122_v20 }
  0x34   :  { %195 = vmatpush.msra.mxu2 %v166_v33 }
  0x36   :  { %196 = vmatpush.msra.mxu2 %v165_v38 }
  0x38   :  { %197 = vmatpush.msra.mxu2 %v164_v39 }
  0x3a   :  { %198 = vmatpush.msra.mxu2 %v163_v40 }
  0x98   :  { %v118_v35 = vpop.f32.mrf.mxu0 }
  0x99   :  { %v119_v36 = vadd.f32 %v236_v34, %v118_v35 }
  0x9b   :  { %v121_v37 = vmax.f32 %v119_v36, 0.0 }
  0x9d   :  { %158 = vmatmul.f32.vlgmr.msra.gmra.mxu1 %v121_v37 }
 0x11a   :  { %v159_v42 = vpop.f32.mrf.mxu1 }
 0x11b   :  { %v160_v43 = vadd.f32 %v237_v41, %v159_v42 }
 0x11d   :  { %v162_v44 = vmax.f32 %v160_v43, 0.0 }
 0x11f   :  { %199 = vmatmul.f32.vlgmr.msra.gmra.mxu2 %v162_v44 }
 0x1a2   :  { %v200_v47 = vpop.f32.mrf.mxu2 }
 0x1a3   :  { %v201_v48 = vadd.f32 %v238_v45, %v200_v47 }
 0x1a5   :  { %239 = vtanh.f32 %v201_v48 }
 0x1ab   :  { %v240_v50 = vpop.eup %239 }
 0x1ac   :  { %v207_v51 = vsel %vm205_vm1, %v240_v50, %v201_v48 }
 0x1ad   :  { %208 = vst [vmem:[#allocation10] sm:$0xff] %v207_v51 }
 0x1ae   :  { %219 = dma.vmem_to_hbm [thread:$0]  %s215_s25, 128, %s217_s28, [#allocation4]  }
 0x1af   :  { %367 = dma.done.wait [#allocation4], 128  }
 0x1b0   :  { %368 = vsyncadd [#allocation4], 4294967168 }
 0x1b1   :  { %224 = vsyncpa [#allocation3], 1 }
 0x1b2   :  { %225 = vsyncpa [#allocation6], 1 }
 0x1b3   :  { %226 = vsyncpa [#allocation9], 1 }
 0x1b4   :  { %227 = vsyncpa [#allocation4], 1 }

</bundles_post_ra>
